<compile_context>
chip_gen: v5e
topology: v5e:2x2
jax: 0.10.0
libtpu: 0.0.40
codegen_flags: <defaults>
</compile_context>

<pallas_src>
import jax
import jax.numpy as jnp
from jax.experimental import pallas as pl
from jax.experimental.pallas import tpu as pltpu


def se_kernel(x_ref, w1_ref, w2_ref, o_ref):
    # x_ref:  (Bt, C, HW)  batch tile; channels on sublanes, HW on lanes.
    # w1_ref: (C, Cr)      squeeze FC weight (transposed vs torch Linear).
    # w2_ref: (Cr, C)      excite FC weight.
    x = x_ref[...]                                              # (Bt, C, HW)
    hw = x.shape[-1]

    # AdaptiveAvgPool2d(1): lane-axis reduction with f32 accumulation,
    # without materializing an f32 copy of the whole tile.
    pooled = jnp.sum(x, axis=-1, dtype=jnp.float32) * (1.0 / hw)   # (Bt, C)

    # FC -> ReLU -> FC -> Sigmoid, batched over the Bt rows of this tile.
    h = jnp.dot(pooled, w1_ref[...], preferred_element_type=jnp.float32)
    h = jnp.maximum(h, 0.0)                                     # (Bt, Cr)
    s = jnp.dot(h, w2_ref[...], preferred_element_type=jnp.float32)
    s = jax.nn.sigmoid(s)                                       # (Bt, C)

    # Channel-wise rescale: broadcast the per-(b, c) gate across the HW lanes.
    gate = s.astype(x.dtype)[:, :, None]                        # (Bt, C, 1)
    o_ref[...] = (x * gate).astype(o_ref.dtype)


def _vmem_capacity_bytes():
    """Per-TensorCore VMEM capacity; conservative fallback if query fails."""
    try:
        return int(pltpu.get_tpu_info().vmem_capacity_bytes)
    except Exception:
        return 64 * 1024 * 1024  # v7x has the smallest VMEM (64 MiB per TC)


def _plan_tiling(B, C, HW, x_itemsize, weight_bytes, min_steps=8):
    """Pick the batch-tile Bt and the VMEM limit.

    Pipeline footprint = 2x (double-buffered) input tile + 2x output tile
    + resident weights + scratch slack.  Keep that within ~half of the
    per-generation VMEM capacity, and keep the grid >= min_steps where B
    allows so DMA/compute overlap and both v7x TensorCores stay busy.
    """
    vmem_cap = _vmem_capacity_bytes()
    slack = 2 * 1024 * 1024
    per_elem = C * HW * x_itemsize                   # one batch-element slab

    # Largest Bt whose 4x-buffered tile fits in ~half the VMEM capacity.
    tile_budget = max((vmem_cap // 2 - weight_bytes - slack) // 4, per_elem)
    bt = max(1, min(B, tile_budget // per_elem))
    # Cap Bt so the grid has >= min_steps steps (pipelining / TC balance).
    bt = max(1, min(bt, max(1, B // min_steps)))

    grid_len = pl.cdiv(B, bt)
    needed = 4 * bt * per_elem + weight_bytes + slack
    # TODO(synk): if a single element slab (Bt=1) still exceeds capacity,
    # fall back to an HW-chunked two-pass pooling/rescale pipeline.
    vmem_limit = int(min(vmem_cap, max(needed, 32 * 1024 * 1024)))
    return bt, grid_len, vmem_limit


def se_layer(x_nchw, w1, w2, *, donate_x=False):
    """x_nchw: (B, C, H, W); w1: (C, Cr); w2: (Cr, C)."""
    B, C, H, W = x_nchw.shape
    HW = H * W
    Cr = w1.shape[1]

    # Zero-cost view: NCHW row-major flattens directly to (B, C, HW).
    x_flat = x_nchw.reshape(B, C, HW)

    weight_bytes = (w1.size * w1.dtype.itemsize + w2.size * w2.dtype.itemsize)
    Bt, grid_len, vmem_limit = _plan_tiling(
        B, C, HW, x_nchw.dtype.itemsize, weight_bytes)

    out = pl.pallas_call(
        se_kernel,
        out_shape=jax.ShapeDtypeStruct((B, C, HW), x_nchw.dtype),
        grid_spec=pltpu.PrefetchScalarGridSpec(
            num_scalar_prefetch=0,
            grid=(grid_len,),
            in_specs=[
                # Activation tile: Bt batch elements, full (C, HW) slab.
                pl.BlockSpec((Bt, C, HW), lambda b: (b, 0, 0)),
                # Weights: constant-index full blocks, resident across steps.
                pl.BlockSpec((C, Cr), lambda b: (0, 0)),
                pl.BlockSpec((Cr, C), lambda b: (0, 0)),
            ],
            out_specs=pl.BlockSpec((Bt, C, HW), lambda b: (b, 0, 0)),
        ),
        compiler_params=pltpu.CompilerParams(
            dimension_semantics=("parallel",),
            vmem_limit_bytes=vmem_limit,
        ),
        # In-place rescale when the caller donates x (free end-to-end win).
        input_output_aliases={0: 0} if donate_x else {},
    )(x_flat, w1, w2)

    return out.reshape(B, C, H, W)


def se_layer_ref(x_nchw, w1, w2):
    """Pure-JAX reference matching the PyTorch module semantics."""
    y = jnp.mean(x_nchw, axis=(2, 3))                  # (B, C)
    y = jnp.maximum(y @ w1, 0.0)                       # (B, Cr)
    y = jax.nn.sigmoid(y @ w2)                         # (B, C)
    return x_nchw * y[:, :, None, None]


if __name__ == "__main__":
    B, C, H, W = 16, 64, 16, 16
    reduction = 16
    Cr = C // reduction

    key = jax.random.PRNGKey(0)
    kx, k1, k2 = jax.random.split(key, 3)

    x = jax.random.normal(kx, (B, C, H, W), dtype=jnp.float32)
    # torch Linear weight is (out, in); store the transposed form used in y @ W.
    w1 = jax.random.normal(k1, (C, Cr), dtype=jnp.float32) * (1.0 / jnp.sqrt(C))
    w2 = jax.random.normal(k2, (Cr, C), dtype=jnp.float32) * (1.0 / jnp.sqrt(Cr))

    out = jax.block_until_ready(se_layer(x, w1, w2))
    ref = jax.block_until_ready(se_layer_ref(x, w1, w2))

    assert out.shape == x.shape
    assert jnp.allclose(out, ref, atol=1e-5, rtol=1e-5), "mismatch vs reference"
    print("KERNEL_OK")
</pallas_src>

<mosaic_0001>
module attributes {stable_mosaic.version = 11 : i64} {
  func.func @se_kernel(%arg0: i32, %arg1: memref<2x64x256xf32, #tpu.memory_space<vmem>>, %arg2: memref<64x4xf32, #tpu.memory_space<vmem>>, %arg3: memref<4x64xf32, #tpu.memory_space<vmem>>, %arg4: memref<2x64x256xf32, #tpu.memory_space<vmem>>) attributes {dimension_semantics = [#tpu.dimension_semantics<parallel>], iteration_bounds = array<i64: 8>, scalar_prefetch = 0 : i64, scratch_operands = 0 : i64, tpu.core_type = #tpu.core_type<tc>, window_params = [{transform_indices = @transform_0, window_bounds = array<i64: 2, 64, 256>}, {pipeline_mode = #tpu.pipeline_mode<synchronous>, transform_indices = @transform_1, window_bounds = array<i64: 64, 4>}, {pipeline_mode = #tpu.pipeline_mode<synchronous>, transform_indices = @transform_2, window_bounds = array<i64: 4, 64>}, {transform_indices = @transform_3, window_bounds = array<i64: 2, 64, 256>}]} {
    %c0 = arith.constant 0 : index
    %c0_0 = arith.constant 0 : index
    %c0_1 = arith.constant 0 : index
    %0 = vector.load %arg1[%c0, %c0_0, %c0_1] : memref<2x64x256xf32, #tpu.memory_space<vmem>>, vector<2x64x256xf32>
    %cst = arith.constant dense<0.000000e+00> : vector<2x64xf32>
    %1 = vector.multi_reduction <add>, %0, %cst [2] : vector<2x64x256xf32> to vector<2x64xf32>
    %cst_2 = arith.constant 3.906250e-03 : f32
    %2 = vector.broadcast %cst_2 : f32 to vector<2x64xf32>
    %3 = arith.mulf %1, %2 : vector<2x64xf32>
    %c0_3 = arith.constant 0 : index
    %c0_4 = arith.constant 0 : index
    %4 = vector.load %arg2[%c0_3, %c0_4] : memref<64x4xf32, #tpu.memory_space<vmem>>, vector<64x4xf32>
    %cst_5 = arith.constant dense<0.000000e+00> : vector<2x4xf32>
    %5 = tpu.matmul %3, %4, %cst_5 {dimension_numbers = #tpu.dot_dimension_numbers<[1], [0], [0], [1], [0, 0, 1, 1], [], []>} : vector<2x64xf32>, vector<64x4xf32>, vector<2x4xf32> -> vector<2x4xf32>
    %cst_6 = arith.constant 0.000000e+00 : f32
    %6 = vector.broadcast %cst_6 : f32 to vector<2x4xf32>
    %7 = arith.maximumf %5, %6 : vector<2x4xf32>
    %c0_7 = arith.constant 0 : index
    %c0_8 = arith.constant 0 : index
    %8 = vector.load %arg3[%c0_7, %c0_8] : memref<4x64xf32, #tpu.memory_space<vmem>>, vector<4x64xf32>
    %cst_9 = arith.constant dense<0.000000e+00> : vector<2x64xf32>
    %9 = tpu.matmul %7, %8, %cst_9 {dimension_numbers = #tpu.dot_dimension_numbers<[1], [0], [0], [1], [0, 0, 1, 1], [], []>} : vector<2x4xf32>, vector<4x64xf32>, vector<2x64xf32> -> vector<2x64xf32>
    %10 = arith.negf %9 : vector<2x64xf32>
    %11 = math.exp %10 : vector<2x64xf32>
    %cst_10 = arith.constant 1.000000e+00 : f32
    %12 = vector.broadcast %cst_10 : f32 to vector<2x64xf32>
    %13 = arith.addf %12, %11 : vector<2x64xf32>
    %14 = arith.divf %12, %13 : vector<2x64xf32>
    %15 = vector.shape_cast %14 : vector<2x64xf32> to vector<2x64x1xf32>
    %16 = vector.broadcast %15 : vector<2x64x1xf32> to vector<2x64x256xf32>
    %17 = arith.mulf %0, %16 : vector<2x64x256xf32>
    %c0_11 = arith.constant 0 : index
    %c0_12 = arith.constant 0 : index
    %c0_13 = arith.constant 0 : index
    %18 = vector.load %arg4[%c0_11, %c0_12, %c0_13] : memref<2x64x256xf32, #tpu.memory_space<vmem>>, vector<2x64x256xf32>
    tpu.vector_store %arg4[%c0_11, %c0_12, %c0_13], %17 {strides = array<i32>} : memref<2x64x256xf32, #tpu.memory_space<vmem>>, vector<2x64x256xf32>,
    return
  }
  func.func @transform_0(%arg0: i32) -> (i32, i32, i32) {
    %c0_i32 = arith.constant 0 : i32
    %c0_i32_0 = arith.constant 0 : i32
    %c0_i32_1 = arith.constant 0 : i32
    return %arg0, %c0_i32, %c0_i32_0 : i32, i32, i32
  }
  func.func @transform_1(%arg0: i32) -> (i32, i32) {
    %c0_i32 = arith.constant 0 : i32
    %c0_i32_0 = arith.constant 0 : i32
    %c0_i32_1 = arith.constant 0 : i32
    return %c0_i32, %c0_i32_0 : i32, i32
  }
  func.func @transform_2(%arg0: i32) -> (i32, i32) {
    %c0_i32 = arith.constant 0 : i32
    %c0_i32_0 = arith.constant 0 : i32
    %c0_i32_1 = arith.constant 0 : i32
    return %c0_i32, %c0_i32_0 : i32, i32
  }
  func.func @transform_3(%arg0: i32) -> (i32, i32, i32) {
    %c0_i32 = arith.constant 0 : i32
    %c0_i32_0 = arith.constant 0 : i32
    %c0_i32_1 = arith.constant 0 : i32
    return %arg0, %c0_i32, %c0_i32_0 : i32, i32, i32
  }
}

</mosaic_0001>

<bundles_post_ra>
// kernel: tpu_custom_call.1
= control target key start
LH: loop header
LB: loop body
LE: loop exit
PB: predicated region body
PF: predicated region fallthrough
CT: control target
= control target key end

     0   :  { %8 = vsyncpa [#allocation3], 0  ;;  %s1266_s0 = inlined_call_operand.hbm [shape: f32[16,64,256], index: 0, kind: input, shape index: {}]   ;;  %s1267_s1 = inlined_call_operand.vmem [shape: f32[64,4], index: 1, kind: input, shape index: {}]   ;;  %s1268_s2 = inlined_call_operand.vmem [shape: f32[4,64], index: 2, kind: input, shape index: {}]   ;;  %s1269_s3 = inlined_call_operand.hbm [shape: f32[16,64,256], index: 3, kind: output, shape index: {}]  }
   0x1   :  { %10 = vsyncpa [#allocation3 + $0x1], 0 }
   0x2   :  { %11 = vsyncpa [#allocation4], 0 }
   0x3   :  { %13 = vsyncpa [#allocation4 + $0x1], 0  ;;  %s903_s12 = smov 0   ;;  %s905_s13 = smov 0  }
   0x4   :  { %s907_s14 = smov 0   ;;  %s909_s15 = smov 0  }
   0x5 LB: > { %s924_s16 = sadd.s32 4294967295, %s877_s15   ;;  %s686_s17 = sadd.s32 4294967294, %s877_s15   ;;  %s877_s15 = sphi %s909_s15, %s1286_s15   ;;  %s873_s14 = sphi %s907_s14, %s1285_s14   ;;  %s869_s13 = sphi %s905_s13, %s1284_s13   ;;  %s865_s12 = sphi %s903_s12, %s1283_s12  }
   0x6   : > { %s928_s18 = sadd.s32 1, %s877_s15   ;;  %s26_s19 = sadd.s32 1, %s873_s14 }
   0x7   : > { %s23_s20 = ssub.s32 %s877_s15, %s928_s18  ;;  %p33_p0 = scmp.ne.s32.totalorder %s873_s14, %s869_s13 }
   0x8   : > { %p24_p1 = scmp.eq.s32.totalorder %s23_s20, 0  ;;  %p34_p2 = scmp.eq.s32.totalorder %s877_s15, 0 }
   0x9   : > { %p39_p3 = scmp.ne.s32.totalorder %s869_s13, %s865_s12  ;;  %p40_p4 = scmp.eq.s32.totalorder %s924_s16, 0 }
   0xa   : > { %s940_s21 = scalar_select %p24_p1, %s873_s14, %s26_s19  }
   0xb   : > { %p942_p5 = por %p34_p2, %p33_p0  ;;  %p946_p6 = por %p40_p4, %p39_p3 }
   0xc   : > { %p105_p7 = scmp.eq.s32.totalorder %s924_s16, 7  ;;  %p111_p8 = scmp.eq.s32.totalorder %s686_s17, 7 }
   0xd   : > { %p722_p9 = scmp.lt.s32.totalorder %s877_s15, 8  ;;  %s137_s26 = sand.u32 1, %s873_s14  }
   0xe   : > { %p952_p10 = por %p105_p7, %p33_p0  ;;  %p956_p11 = por %p111_p8, %p39_p3 }
   0xf   : > { %s707_s27 = sshll.u32 %s877_s15, 8  ;;  %s689_s28 = sshll.u32 %s137_s26, 8 }
  0x10   : > { %s147_s4 = scalar_lea.hbm %s1266_s0, %s707_s27  ;;  %s141_s6 = scalar_lea.vmem [#allocation2], %s689_s28 }
  0x11   : > { %s148_s5 = sshll.u32 %s147_s4, 4  ;;  %s150_s7 = sshll.u32 %s141_s6, 4  ;;  %s149_s5 = int_to_ptr.hbm [resolvable:$true] %s148_s5  ;;  %s151_s7 = int_to_ptr.vmem [resolvable:$true] %s150_s7 }
  0x12   : > { %p967_p12 = pnand %p722_p9, %p942_p5  ;;  %p693_p13 = scmp.ge.s32.totalorder %s877_s15, 1 }
  0x13   : > { %p158_p0 = scmp.lt.s32.totalorder %s877_s15, 9  ;;  %s138_s9 = scalar_lea.sflag [#allocation3], %s137_s26 }
  0x14   : > { %s781_s10 = sshra.s32 %s149_s5, 4  ;;  %p785_p2 = pneg %p967_p12  ;;  %s782_s10 = int_to_ptr.hbm [resolvable:$true] %s781_s10 }
  0x15   : > { %s783_s11 = scalar_lea.hbm %s782_s10, 256  ;;  %s788_s20 = scalar_lea.hbm %s1266_s0, 2048 }
  0x16   : > { %p784_p1 = scmp.ne.s32.totalorder %s782_s10, %s783_s11  ;;  %p789_p5 = scmp.lt.s32.totalorder %s782_s10, %s1266_s0 }
  0x17   : > { %p790_p7 = scmp.lt.s32.totalorder %s788_s20, %s783_s11 }
  0x18   : > { %p786_p3 = pnand %p785_p2, %p784_p1 }
  0x19   : > { %p791_p8 = por %p790_p7, %p789_p5 }
  0x1a   : > { %p787_p4 = pneg %p786_p3 }
  0x1c   : > { %p792_p9 = pnand %p791_p8, %p787_p4 }
  0x1e   : > { %795 = shalt.err (!%p792_p9)
}
  0x1f   : > { %s879_s26 = smov 256   ;;  %s880_s28 = smov 16  }
  0x20   : > { %717 = dma.hbm_to_vmem [thread:$0]  (!%p967_p12), %s149_s5, 4096, %s151_s7, %s138_s9, %s879_s26, %s879_s26, %s880_s28  }
  0x21   : > { %p159_p1 = pnand %p693_p13, %p158_p0 }
  0x23   : > { %162 = sbr.rel (%p159_p1) target bundleno = 697 (0x2b9), region = 32 }
  0x28   : > { %s988_s29 = sand.u32 1, %s869_s13  }
  0x29   : > { %s694_s30 = sshll.u32 %s988_s29, 8  ;;  %s165_s4 = scalar_lea.sflag [#allocation3], %s988_s29 }
  0x2a   : > { %s994_s6 = scalar_lea.vmem [#allocation2], %s694_s30 }
  0x2b   : > { %856 = dma.done.wait (%p946_p6), %s165_s4, 4096  }
  0x2c   : > { %858 = vsyncadd (%p946_p6), %s165_s4, 4294963200  ;;  %v1001_v0 = vld [vmem:[%s994_s6 + $0x80] sm:$0xff]  ;;  %v1004_v1 = vld [vmem:[%s994_s6 + $0x88] sm:$0xff]  ;;  %vm319_vm0 = vcmask 130112   ;;  %vm323_vm1 = vcmask 195712   ;;  %vm327_vm2 = vcmask 261312  }
  0x2d   : > { %v1007_v2 = vld [vmem:[%s994_s6] sm:$0xff]  ;;  %v250_v3 = vadd.f32 %v1004_v1, %v1001_v0  ;;  %v1012_v4 = vld [vmem:[%s994_s6 + $0x8] sm:$0xff]  ;;  %v1025_v9 = vld [vmem:[%s994_s6 + $0x90] sm:$0xff]  ;;  %vm331_vm3 = vcmask 326912   ;;  %vm335_vm4 = vcmask 392512   ;;  %vm339_vm5 = vcmask 458112  }
  0x2e   : > { %v1015_v5 = vld [vmem:[%s994_s6 + $0x20] sm:$0xff]  ;;  %v1018_v6 = vld [vmem:[%s994_s6 + $0x28] sm:$0xff]  ;;  %v226_v7 = vadd.f32 %v1012_v4, %v1007_v2  ;;  %v1028_v10 = vld [vmem:[%s994_s6 + $0x98] sm:$0xff]  ;;  %vm343_vm6 = vcmask 523712   ;;  %vm360_vm7 = vcmask 1041409   ;;  %vm362_vm8 = vcmask 523264  }
  0x2f   : > { %v232_v8 = vadd.f32 %v1018_v6, %v1015_v5  ;;  %251 = vadd.xlane.f32.xlu1 %v250_v3  ;;  %v1031_v11 = vld [vmem:[%s994_s6 + $0x10] sm:$0xff]  ;;  %v1034_v12 = vld [vmem:[%s994_s6 + $0x18] sm:$0xff]  ;;  %v1037_v13 = vld [vmem:[%s994_s6 + $0xa0] sm:$0xff]  ;;  %v253_v15 = vadd.f32 %v1028_v10, %v1025_v9  ;;  %vm391_vm9 = vcmask 1043456   ;;  %vm387_vm10 = vcmask 31744   ;;  %s1169_s7 = scalar_lea.vmem [#allocation5], %s694_s30 }
  0x30   : > { %227 = vadd.xlane.f32.xlu0 %v226_v7  ;;  %v1040_v14 = vld [vmem:[%s994_s6 + $0xa8] sm:$0xff]  ;;  %v229_v16 = vadd.f32 %v1034_v12, %v1031_v11  ;;  %v1049_v18 = vld [vmem:[%s994_s6 + $0xb0] sm:$0xff]  ;;  %v1052_v19 = vld [vmem:[%s994_s6 + $0xb8] sm:$0xff]  ;;  %v1270_v7 = vlaneseq  ;;  %s709_s30 = sshll.u32 %s924_s16, 8  ;;  %s610_s11 = sshll.u32 %s1169_s7, 4  ;;  %s611_s11 = int_to_ptr.vmem [resolvable:$true] %s610_s11 }
  0x31   : > { %233 = vadd.xlane.f32.xlu2 %v232_v8  ;;  %v256_v17 = vadd.f32 %v1040_v14, %v1037_v13  ;;  %v1055_v20 = vld [vmem:[%s994_s6 + $0x30] sm:$0xff]  ;;  %v1058_v21 = vld [vmem:[%s994_s6 + $0x38] sm:$0xff]  ;;  %v1061_v22 = vld [vmem:[%s994_s6 + $0x40] sm:$0xff]  ;;  %v259_v24 = vadd.f32 %v1052_v19, %v1049_v18  ;;  %s609_s10 = scalar_lea.hbm %s1269_s3, %s709_s30  ;;  %s597_s19 = scalar_lea.sflag [#allocation4], %s988_s29 }
  0x32   : > { %v1064_v23 = vld [vmem:[%s994_s6 + $0x48] sm:$0xff]  ;;  %v235_v25 = vadd.f32 %v1058_v21, %v1055_v20  ;;  %v1073_v27 = vld [vmem:[%s994_s6 + $0x50] sm:$0xff]  ;;  %v1076_v28 = vld [vmem:[%s994_s6 + $0x58] sm:$0xff]  ;;  %v315_v8 = vand.u32 127, %v1270_v7  ;;  %s612_s17 = sshll.u32 %s609_s10, 4  ;;  %s831_s26 = scalar_lea.hbm %s1269_s3, 2048  ;;  %s613_s17 = int_to_ptr.hbm [resolvable:$true] %s612_s17 }
  0x33   : > { %v238_v26 = vadd.f32 %v1064_v23, %v1061_v22  ;;  %v1079_v29 = vld [vmem:[%s994_s6 + $0xc0] sm:$0xff]  ;;  %v1082_v30 = vld [vmem:[%s994_s6 + $0xc8] sm:$0xff]  ;;  %v1085_v31 = vld [vmem:[%s994_s6 + $0xd0] sm:$0xff]  ;;  %v241_v33 = vadd.f32 %v1076_v28, %v1073_v27  ;;  %s825_s16 = sshra.s32 %s613_s17, 4  ;;  %s826_s16 = int_to_ptr.hbm [resolvable:$true] %s825_s16 }
  0x34   : > { %1278 = vst [vmem:[#allocation8_spill] sm:$0xff] %v1085_v31  ;;  %v1088_v32 = vld [vmem:[%s994_s6 + $0xd8] sm:$0xff]  ;;  %v262_v34 = vadd.f32 %v1082_v30, %v1079_v29  ;;  %v1097_v36 = vld [vmem:[%s994_s6 + $0xe0] sm:$0xff]  ;;  %v1100_v37 = vld [vmem:[%s994_s6 + $0xe8] sm:$0xff]  ;;  %s827_s20 = scalar_lea.hbm %s826_s16, 256  ;;  %p832_p0 = scmp.lt.s32.totalorder %s826_s16, %s1269_s3 }
  0x35   : > { %1279 = vst [vmem:[#allocation9_spill] sm:$0xff] %v1088_v32  ;;  %v265_v35 = vadd.f32 %v1088_v32, %v1085_v31  ;;  %v1103_v38 = vld [vmem:[%s994_s6 + $0x60] sm:$0xff]  ;;  %v1106_v39 = vld [vmem:[%s994_s6 + $0x68] sm:$0xff]  ;;  %v1109_v40 = vld [vmem:[%s994_s6 + $0x70] sm:$0xff]  ;;  %v268_v42 = vadd.f32 %v1100_v37, %v1097_v36  ;;  %p828_p6 = scmp.ne.s32.totalorder %s826_s16, %s827_s20  ;;  %p833_p2 = scmp.lt.s32.totalorder %s831_s26, %s827_s20 }
  0x36   : > { %v1112_v41 = vld [vmem:[%s994_s6 + $0x78] sm:$0xff]  ;;  %v244_v43 = vadd.f32 %v1106_v39, %v1103_v38  ;;  %v1121_v45 = vld [vmem:[%s994_s6 + $0xf0] sm:$0xff]  ;;  %v295_v53 = vld [vmem:[%s1267_s1 + $0x28] sm:$0xff] }
  0x37   : > { %254 = vadd.xlane.f32.xlu1 %v253_v15  ;;  %v247_v44 = vadd.f32 %v1112_v41, %v1109_v40  ;;  %v1124_v46 = vld [vmem:[%s994_s6 + $0xf8] sm:$0xff]  ;;  %v296_v52 = vld [vmem:[%s1267_s1 + $0x30] sm:$0xff]  ;;  %v294_v54 = vld [vmem:[%s1267_s1 + $0x20] sm:$0xff]  ;;  %p829_p12 = pnand %p828_p6, %p952_p10  ;;  %p834_p3 = por %p833_p2, %p832_p0 }
  0x38   : > { %230 = vadd.xlane.f32.xlu0 %v229_v16  ;;  %v271_v47 = vadd.f32 %v1124_v46, %v1121_v45  ;;  %v297_v48 = vld [vmem:[%s1267_s1 + $0x38] sm:$0xff]  ;;  %v292_v59 = vld [vmem:[%s1267_s1 + $0x10] sm:$0xff]  ;;  %v291_v60 = vld [vmem:[%s1267_s1 + $0x8] sm:$0xff] }
  0x39   : > { %257 = vadd.xlane.f32.xlu2 %v256_v17  ;;  %373 = vmatpush.msra.mxu0 %v297_v48  ;;  %v293_v55 = vld [vmem:[%s1267_s1 + $0x18] sm:$0xff]  ;;  %v290_v61 = vld [vmem:[%s1267_s1] sm:$0xff]  ;;  %p830_p13 = pneg %p829_p12 }
  0x3b   : > { %374 = vmatpush.msra.mxu0 %v296_v52  ;;  %p835_p4 = pnand %p834_p3, %p830_p13 }
  0x3d   : > { %375 = vmatpush.msra.mxu0 %v295_v53 }
  0x3f   : > { %260 = vadd.xlane.f32.xlu1 %v259_v24  ;;  %376 = vmatpush.msra.mxu0 %v294_v54  ;;  %v317_v24 = vadd.s32 4294967288, %v315_v8 }
  0x40   : > { %236 = vadd.xlane.f32.xlu0 %v235_v25 }
  0x41   : > { %239 = vadd.xlane.f32.xlu2 %v238_v26  ;;  %377 = vmatpush.msra.mxu0 %v293_v55 }
  0x43   : > { %378 = vmatpush.msra.mxu0 %v292_v59 }
  0x45   : > { %379 = vmatpush.msra.mxu0 %v291_v60  ;;  %v329_v60 = vadd.s32 4294967264, %v315_v8 }
  0x47   : > { %242 = vadd.xlane.f32.xlu1 %v241_v33  ;;  %380 = vmatpush.msra.mxu0 %v290_v61 }
  0x48   : > { %263 = vadd.xlane.f32.xlu0 %v262_v34 }
  0x49   : > { %266 = vadd.xlane.f32.xlu2 %v265_v35  ;;  %v321_v35 = vadd.s32 4294967280, %v315_v8 }
  0x4f   : > { %269 = vadd.xlane.f32.xlu1 %v268_v42 }
  0x50   : > { %245 = vadd.xlane.f32.xlu0 %v244_v43 }
  0x51   : > { %248 = vadd.xlane.f32.xlu2 %v247_v44  ;;  %v325_v44 = vadd.s32 4294967272, %v315_v8 }
  0x58   : > { %272 = vadd.xlane.f32.xlu0 %v271_v47 }
  0xa2   : > { %v252_v49 = vpop.xlane.xlu1 %251 }
  0xa3   : > { %v228_v50 = vpop.xlane.xlu0 %227  ;;  %v282_v26 = vmul.f32 0.00390625, %v252_v49 }
  0xa4   : > { %v234_v51 = vpop.xlane.xlu2 %233  ;;  %v274_v33 = vmul.f32 0.00390625, %v228_v50 }
  0xa5   : > { %v276_v42 = vmul.f32 0.00390625, %v234_v51  ;;  %v345_v52 = vperm.slane %v282_v26, %v315_v8 }
  0xa6   : > { %v316_v53 = vperm.slane %v274_v33, %v315_v8 }
  0xa7   : > { %v322_v59 = vperm.slane %v276_v42, %v321_v35 }
  0xaa   : > { %v255_v56 = vpop.xlane.xlu1 %254 }
  0xab   : > { %v231_v57 = vpop.xlane.xlu0 %230  ;;  %v283_v34 = vmul.f32 0.00390625, %v255_v56  ;;  %v333_v56 = vadd.s32 4294967256, %v315_v8 }
  0xac   : > { %v258_v58 = vpop.xlane.xlu2 %257  ;;  %v275_v25 = vmul.f32 0.00390625, %v231_v57 }
  0xad   : > { %v284_v48 = vmul.f32 0.00390625, %v258_v58  ;;  %v346_v54 = vperm.slane %v283_v34, %v317_v24 }
  0xae   : > { %v318_v43 = vperm.slane %v275_v25, %v317_v24 }
  0xaf   : > { %v348_v32 = vperm.slane %v284_v48, %v321_v35  ;;  %v347_v26 = vsel %vm319_vm0, %v346_v54, %v345_v52 }
  0xb0   : > { %v320_v49 = vsel %vm319_vm0, %v318_v43, %v316_v53 }
  0xb1   : > { %v349_v35 = vsel %vm323_vm1, %v348_v32, %v347_v26 }
  0xb2   : > { %v261_v62 = vpop.xlane.xlu1 %260 }
  0xb3   : > { %v237_v63 = vpop.xlane.xlu0 %236  ;;  %v285_v55 = vmul.f32 0.00390625, %v261_v62 }
  0xb4   : > { %v240_v3 = vpop.xlane.xlu2 %239  ;;  %v277_v47 = vmul.f32 0.00390625, %v237_v63  ;;  %v337_v63 = vadd.s32 4294967248, %v315_v8 }
  0xb5   : > { %v278_v61 = vmul.f32 0.00390625, %v240_v3  ;;  %v350_v24 = vperm.slane %v285_v55, %v325_v44  ;;  %v324_v3 = vsel %vm323_vm1, %v322_v59, %v320_v49 }
  0xb6   : > { %v326_v50 = vperm.slane %v277_v47, %v325_v44 }
  0xb7   : > { %v351_v53 = vsel %vm327_vm2, %v350_v24, %v349_v35 }
  0xb8   : > { %v328_v42 = vsel %vm327_vm2, %v326_v50, %v324_v3 }
  0xba   : > { %v243_v15 = vpop.xlane.xlu1 %242 }
  0xbb   : > { %v264_v16 = vpop.xlane.xlu0 %263  ;;  %v279_v51 = vmul.f32 0.00390625, %v243_v15  ;;  %v341_v15 = vadd.s32 4294967240, %v315_v8 }
  0xbc   : > { %v267_v17 = vpop.xlane.xlu2 %266  ;;  %v286_v7 = vmul.f32 0.00390625, %v264_v16  ;;  %v330_v16 = vperm.slane %v278_v61, %v329_v60 }
  0xbd   : > { %v287_v62 = vmul.f32 0.00390625, %v267_v17  ;;  %v334_v43 = vperm.slane %v279_v51, %v333_v56 }
  0xbe   : > { %v352_v33 = vperm.slane %v286_v7, %v329_v60  ;;  %v332_v17 = vsel %vm331_vm3, %v330_v16, %v328_v42 }
  0xbf   : > { %v354_v52 = vperm.slane %v287_v62, %v333_v56  ;;  %v336_v55 = vsel %vm335_vm4, %v334_v43, %v332_v17  ;;  %v386_v56 = vld [vmem:[%s1268_s2] sm:$0xf] }
  0xc0   : > { %v353_v44 = vsel %vm331_vm3, %v352_v33, %v351_v53  ;;  %697 = vmatpush.msk.msra.mxu1 %vm391_vm9, %v386_v56 }
  0xc1   : > { %v355_v8 = vsel %vm335_vm4, %v354_v52, %v353_v44 }
  0xc2   : > { %v270_v25 = vpop.xlane.xlu1 %269 }
  0xc3   : > { %v246_v57 = vpop.xlane.xlu0 %245  ;;  %v288_v34 = vmul.f32 0.00390625, %v270_v25 }
  0xc4   : > { %v280_v31 = vmul.f32 0.00390625, %v246_v57  ;;  %v249_v58 = vpop.xlane.xlu2 %248 }
  0xc5   : > { %v281_v47 = vmul.f32 0.00390625, %v249_v58  ;;  %v356_v54 = vperm.slane %v288_v34, %v337_v63 }
  0xc6   : > { %v338_v48 = vperm.slane %v280_v31, %v337_v63  ;;  %v1280_v63 = vlaneseq }
  0xc7   : > { %v342_v59 = vperm.slane %v281_v47, %v341_v15  ;;  %v357_v32 = vsel %vm339_vm5, %v356_v54, %v355_v8 }
  0xc8   : > { %v340_v61 = vsel %vm339_vm5, %v338_v48, %v336_v55  ;;  %v436_v58 = vshrl.u32 %v1280_v63, 7 }
  0xc9   : > { %v344_v31 = vsel %vm343_vm6, %v342_v59, %v340_v61 }
  0xca   : > { %760 = vset.pattern.permute.xlu1 %v436_v58  ;;  %v449_v26 = vadd.s32 16, %v436_v58  ;;  %v443_v24 = vadd.s32 8, %v436_v58  ;;  %v455_v54 = vadd.s32 24, %v436_v58  ;;  %v473_v59 = vadd.s32 48, %v436_v58 }
  0xcb   : > { %v273_v7 = vpop.xlane.xlu0 %272  ;;  %v479_v61 = vadd.s32 56, %v436_v58 }
  0xcc   : > { %v289_v60 = vmul.f32 0.00390625, %v273_v7  ;;  %762 = vset.pattern.permute.xlu0 %v449_v26  ;;  %761 = vset.pattern.permute.xlu2 %v443_v24  ;;  %v461_v7 = vadd.s32 32, %v436_v58 }
  0xce   : > { %v358_v57 = vperm.slane %v289_v60, %v341_v15  ;;  %v467_v60 = vadd.s32 40, %v436_v58 }
  0xd0   : > { %v359_v49 = vsel %vm343_vm6, %v358_v57, %v357_v32 }
  0xd1   : > { %v361_v50 = vsel %vm360_vm7, %v359_v49, %v344_v31 }
  0xd2   : > { %696 = vmatmul.msk.f32.vlgmr.msra.gmra.mxu0 %vm362_vm8, %v361_v50 }
 0x14f   : > { %v382_v51 = vpop.f32.mrf.mxu0 }
 0x150   : > { %v385_v25 = vmax.f32 %v382_v51, 0.0 }
 0x152   : > { %698 = vmatmul.msk.f32.vlgmr.msra.gmra.mxu1 %vm387_vm10, %v385_v25 }
 0x1cf   : > { %v412_v62 = vpop.f32.mrf.mxu1 }
 0x1d0   : > { %v699_v3 = vmul.f32 -1.442695, %v412_v62 }
 0x1d2   : > { %777 = vpow2.f32 %v699_v3 }
 0x1d8   : > { %v778_v16 = vpop.eup %777 }
 0x1d9   : > { %v418_v33 = vadd.f32 1.0, %v778_v16 }
 0x1db   : > { %779 = vrcp.f32 %v418_v33  ;;  %v430_v15 = vand.u32 2147483648, %v418_v33  ;;  %v428_v35 = vand.u32 2147483647, %v418_v33  ;;  %vm424_vm12 = vweird.f32 %v418_v33 }
 0x1dd   : > { %v431_v53 = vor.u32 1.1754944e-38, %v430_v15  ;;  %vm429_vm14 = vcmp.eq.f32.partialorder %v428_v35, 8.507059e+37  ;;  %v1282_v15 = vld [vmem:[#allocation9_spill] sm:$0xff] }
 0x1e1   : > { %v780_v34 = vpop.eup %779 }
 0x1e2   : > { %v420_v42 = vmul.f32 %v780_v34, %v418_v33  ;;  %vm425_vm11 = vweird.f32 %v780_v34 }
 0x1e3   : > { %vm426_vm13 = vmor %vm424_vm12, %vm425_vm11 }
 0x1e4   : > { %v421_v43 = vsub.f32 1.0, %v420_v42 }
 0x1e6   : > { %v422_v47 = vmul.f32 %v780_v34, %v421_v43 }
 0x1e8   : > { %v423_v48 = vadd.f32 %v780_v34, %v422_v47 }
 0x1ea   : > { %v427_v52 = vsel %vm426_vm13, %v780_v34, %v423_v48 }
 0x1eb   : > { %v432_v17 = vsel %vm429_vm14, %v431_v53, %v427_v52 }
 0x1ec   : > { %v434_v44 = vperm.slane %v432_v17, 0  ;;  %v483_v55 = vperm.slane %v432_v17, 1 }
 0x1ee   : > { %451 = vperm.xlu0 %762, %v434_v44   ;;  %445 = vperm.xlu2 %761, %v434_v44  }
 0x1ef   : > { %439 = vperm.xlu1 %760, %v434_v44  }
 0x1f6   : > { %769 = vset.pattern.permute.xlu0 %v443_v24  ;;  %763 = vset.pattern.permute.xlu2 %v455_v54 }
 0x1f7   : > { %764 = vset.pattern.permute.xlu1 %v461_v7 }
 0x1fe   : > { %494 = vperm.xlu0 %769, %v483_v55   ;;  %457 = vperm.xlu2 %763, %v434_v44  }
 0x1ff   : > { %463 = vperm.xlu1 %764, %v434_v44  }
 0x206   : > { %774 = vset.pattern.permute.xlu0 %v473_v59  ;;  %765 = vset.pattern.permute.xlu2 %v467_v60 }
 0x207   : > { %766 = vset.pattern.permute.xlu1 %v473_v59 }
 0x20e   : > { %524 = vperm.xlu0 %774, %v483_v55   ;;  %469 = vperm.xlu2 %765, %v434_v44  }
 0x20f   : > { %475 = vperm.xlu1 %766, %v434_v44  }
 0x216   : > { %767 = vset.pattern.permute.xlu2 %v479_v61  ;;  %776 = vset.pattern.permute.xlu0 %v479_v61 }
 0x217   : > { %768 = vset.pattern.permute.xlu1 %v436_v58 }
 0x21e   : > { %481 = vperm.xlu2 %767, %v434_v44  }
 0x21f   : > { %488 = vperm.xlu1 %768, %v483_v55  }
 0x226   : > { %770 = vset.pattern.permute.xlu2 %v449_v26 }
 0x227   : > { %771 = vset.pattern.permute.xlu1 %v455_v54 }
 0x22e   : > { %500 = vperm.xlu2 %770, %v483_v55  }
 0x22f   : > { %506 = vperm.xlu1 %771, %v483_v55  }
 0x236   : > { %772 = vset.pattern.permute.xlu2 %v461_v7 }
 0x237   : > { %773 = vset.pattern.permute.xlu1 %v467_v60 }
 0x23e   : > { %512 = vperm.xlu2 %772, %v483_v55  }
 0x23f   : > { %518 = vperm.xlu1 %773, %v483_v55  }
 0x246   : > { %775 = vset.pattern.permute.xlu2 %v479_v61 }
 0x248   : > { %v446_v8 = vpop.permute.xlu2 %445 }
 0x249   : > { %v534_v57 = vmul.f32 %v446_v8, %v1031_v11  ;;  %v535_v32 = vmul.f32 %v446_v8, %v1034_v12 }
 0x24b   : > { %566 = vst [vmem:[%s1169_s7 + $0x10] sm:$0xff] %v534_v57 }
 0x24c   : > { %567 = vst [vmem:[%s1169_s7 + $0x18] sm:$0xff] %v535_v32 }
 0x24e   : > { %530 = vperm.xlu2 %775, %v483_v55  }
 0x258   : > { %v458_v31 = vpop.permute.xlu2 %457 }
 0x259   : > { %v538_v49 = vmul.f32 %v458_v31, %v1055_v20  ;;  %v539_v11 = vmul.f32 %v458_v31, %v1058_v21 }
 0x25b   : > { %570 = vst [vmem:[%s1169_s7 + $0x30] sm:$0xff] %v538_v49 }
 0x25c   : > { %571 = vst [vmem:[%s1169_s7 + $0x38] sm:$0xff] %v539_v11 }
 0x260   : > { %v452_v12 = vpop.permute.xlu0 %451 }
 0x261   : > { %v536_v50 = vmul.f32 %v452_v12, %v1015_v5  ;;  %v537_v56 = vmul.f32 %v452_v12, %v1018_v6  ;;  %v440_v51 = vpop.permute.xlu1 %439 }
 0x262   : > { %v532_v25 = vmul.f32 %v440_v51, %v1007_v2  ;;  %v533_v63 = vmul.f32 %v440_v51, %v1012_v4 }
 0x263   : > { %568 = vst [vmem:[%s1169_s7 + $0x20] sm:$0xff] %v536_v50 }
 0x264   : > { %569 = vst [vmem:[%s1169_s7 + $0x28] sm:$0xff] %v537_v56 }
 0x265   : > { %564 = vst [vmem:[%s1169_s7] sm:$0xff] %v532_v25 }
 0x266   : > { %565 = vst [vmem:[%s1169_s7 + $0x8] sm:$0xff] %v533_v63 }
 0x268   : > { %v470_v20 = vpop.permute.xlu2 %469 }
 0x269   : > { %v542_v21 = vmul.f32 %v470_v20, %v1073_v27  ;;  %v543_v5 = vmul.f32 %v470_v20, %v1076_v28 }
 0x26b   : > { %574 = vst [vmem:[%s1169_s7 + $0x50] sm:$0xff] %v542_v21 }
 0x26c   : > { %575 = vst [vmem:[%s1169_s7 + $0x58] sm:$0xff] %v543_v5 }
 0x270   : > { %v495_v2 = vpop.permute.xlu0 %494 }
 0x271   : > { %v550_v4 = vmul.f32 %v495_v2, %v1025_v9  ;;  %v551_v6 = vmul.f32 %v495_v2, %v1028_v10  ;;  %v464_v58 = vpop.permute.xlu1 %463 }
 0x272   : > { %v540_v26 = vmul.f32 %v464_v58, %v1061_v22  ;;  %v541_v24 = vmul.f32 %v464_v58, %v1064_v23 }
 0x273   : > { %582 = vst [vmem:[%s1169_s7 + $0x90] sm:$0xff] %v550_v4 }
 0x274   : > { %583 = vst [vmem:[%s1169_s7 + $0x98] sm:$0xff] %v551_v6 }
 0x275   : > { %572 = vst [vmem:[%s1169_s7 + $0x40] sm:$0xff] %v540_v26 }
 0x276   : > { %573 = vst [vmem:[%s1169_s7 + $0x48] sm:$0xff] %v541_v24 }
 0x278   : > { %v482_v27 = vpop.permute.xlu2 %481 }
 0x279   : > { %v546_v28 = vmul.f32 %v482_v27, %v1109_v40  ;;  %v547_v9 = vmul.f32 %v482_v27, %v1112_v41 }
 0x27b   : > { %578 = vst [vmem:[%s1169_s7 + $0x70] sm:$0xff] %v546_v28 }
 0x27c   : > { %579 = vst [vmem:[%s1169_s7 + $0x78] sm:$0xff] %v547_v9 }
 0x280   : > { %v525_v10 = vpop.permute.xlu0 %524 }
 0x281   : > { %v560_v22 = vmul.f32 %v525_v10, %v1097_v36  ;;  %v561_v23 = vmul.f32 %v525_v10, %v1100_v37  ;;  %v476_v62 = vpop.permute.xlu1 %475 }
 0x282   : > { %v544_v3 = vmul.f32 %v476_v62, %v1103_v38  ;;  %v545_v16 = vmul.f32 %v476_v62, %v1106_v39 }
 0x283   : > { %592 = vst [vmem:[%s1169_s7 + $0xe0] sm:$0xff] %v560_v22 }
 0x284   : > { %593 = vst [vmem:[%s1169_s7 + $0xe8] sm:$0xff] %v561_v23 }
 0x285   : > { %576 = vst [vmem:[%s1169_s7 + $0x60] sm:$0xff] %v544_v3 }
 0x286   : > { %577 = vst [vmem:[%s1169_s7 + $0x68] sm:$0xff] %v545_v16 }
 0x288   : > { %v501_v40 = vpop.permute.xlu2 %500 }
 0x289   : > { %v552_v41 = vmul.f32 %v501_v40, %v1037_v13  ;;  %v553_v36 = vmul.f32 %v501_v40, %v1040_v14 }
 0x28b   : > { %584 = vst [vmem:[%s1169_s7 + $0xa0] sm:$0xff] %v552_v41 }
 0x28c   : > { %585 = vst [vmem:[%s1169_s7 + $0xa8] sm:$0xff] %v553_v36 }
 0x291   : > { %v489_v37 = vpop.permute.xlu1 %488 }
 0x292   : > { %v548_v38 = vmul.f32 %v489_v37, %v1001_v0  ;;  %v549_v39 = vmul.f32 %v489_v37, %v1004_v1 }
 0x294   : > { %580 = vst [vmem:[%s1169_s7 + $0x80] sm:$0xff] %v548_v38 }
 0x295   : > { %581 = vst [vmem:[%s1169_s7 + $0x88] sm:$0xff] %v549_v39 }
 0x298   : > { %v513_v33 = vpop.permute.xlu2 %512 }
 0x299   : > { %v556_v34 = vmul.f32 %v513_v33, %v1079_v29  ;;  %v557_v13 = vmul.f32 %v513_v33, %v1082_v30 }
 0x29b   : > { %588 = vst [vmem:[%s1169_s7 + $0xc0] sm:$0xff] %v556_v34 }
 0x29c   : > { %589 = vst [vmem:[%s1169_s7 + $0xc8] sm:$0xff] %v557_v13 }
 0x2a1   : > { %v507_v14 = vpop.permute.xlu1 %506 }
 0x2a2   : > { %v554_v42 = vmul.f32 %v507_v14, %v1049_v18  ;;  %v555_v0 = vmul.f32 %v507_v14, %v1052_v19  ;;  %v1281_v19 = vld [vmem:[#allocation8_spill] sm:$0xff] }
 0x2a4   : > { %586 = vst [vmem:[%s1169_s7 + $0xb0] sm:$0xff] %v554_v42 }
 0x2a5   : > { %587 = vst [vmem:[%s1169_s7 + $0xb8] sm:$0xff] %v555_v0 }
 0x2a8   : > { %v531_v1 = vpop.permute.xlu2 %530 }
 0x2a9   : > { %v562_v43 = vmul.f32 %v531_v1, %v1121_v45  ;;  %v563_v29 = vmul.f32 %v531_v1, %v1124_v46 }
 0x2ab   : > { %594 = vst [vmem:[%s1169_s7 + $0xf0] sm:$0xff] %v562_v43 }
 0x2ac   : > { %595 = vst [vmem:[%s1169_s7 + $0xf8] sm:$0xff] %v563_v29 }
 0x2b1   : > { %v519_v18 = vpop.permute.xlu1 %518 }
 0x2b2   : > { %v558_v30 = vmul.f32 %v519_v18, %v1281_v19  ;;  %v559_v47 = vmul.f32 %v519_v18, %v1282_v15 }
 0x2b4   : > { %590 = vst [vmem:[%s1169_s7 + $0xd0] sm:$0xff] %v558_v30 }
 0x2b5   : > { %591 = vst [vmem:[%s1169_s7 + $0xd8] sm:$0xff] %v559_v47 }
 0x2b6   : > { %838 = shalt.err (!%p835_p4)
}
 0x2b7   : > { %s881_s29 = smov 256   ;;  %s882_s6 = smov 16  }
 0x2b8   : > { %712 = dma.vmem_to_hbm [thread:$0]  (%p952_p10), %s611_s11, 4096, %s613_s17, %s597_s19, %s881_s29, %s881_s29, %s882_s6  }
 0x2b9 PF: > { %p723_p5 = scmp.ge.s32.totalorder %s877_s15, 2  ;;  %s627_s23 = sand.u32 1, %s865_s12  }
 0x2ba   : > { %s628_s5 = scalar_lea.sflag [#allocation4], %s627_s23 }
 0x2bb   : > { %p719_p7 = pnand %p723_p5, %p956_p11 }
 0x2bd   : > { %p720_p8 = pneg %p719_p7 }
 0x2bf   : > { %860 = dma.done.wait (%p720_p8), %s628_s5, 4096  }
 0x2c0   : > { %862 = vsyncadd (%p720_p8), %s628_s5, 4294963200  ;;  %p16_p9 = scmp.ge.s32.totalorder %s928_s18, 10   ;;  %s1283_s12 = smov %s869_s13 }
 0x2c1   : > { %s1284_s13 = smov %s873_s14  ;;  %s1285_s14 = smov %s940_s21 }
 0x2c2   : > { %s1286_s15 = smov %s928_s18  ;;  %18 = sbr.rel (!%p16_p9) target bundleno = 5 (0x5), region = 77 }
 0x2c7   :  { %634 = vsyncpa [#allocation3], 1 }
 0x2c8   :  { %636 = vsyncpa [#allocation3 + $0x1], 1 }
 0x2c9   :  { %637 = vsyncpa [#allocation4], 1 }
 0x2ca   :  { %639 = vsyncpa [#allocation4 + $0x1], 1 }

</bundles_post_ra>
